<compile_context>
chip_gen: v6e
topology: v6e:2x2x1
jax: 0.10.0
libtpu: 0.0.40
codegen_flags: <defaults>
</compile_context>

<pallas_src>
import numpy as np
import jax
import jax.numpy as jnp
from jax.experimental import pallas as pl
from jax.experimental.pallas import tpu as pltpu


def _round_up(x, m):
    return ((x + m - 1) // m) * m


def _linear_rows_kernel(w_ref, b_ref, xt_ref, o_ref):
    # w_ref:  (n_u, K)        unique gathered weight rows (resident every step)
    # b_ref:  (n_u, 1)        gathered bias, float32 (resident)
    # xt_ref: (K, TILE_BS)    streaming x tile (pre-transposed in the wrapper)
    # o_ref:  (n_u, TILE_BS)  lane-dense output tile
    acc = jax.lax.dot_general(
        w_ref[...], xt_ref[...],
        dimension_numbers=(((1,), (0,)), ((), ())),
        preferred_element_type=jnp.float32,
    )                                                  # (n_u, TILE_BS), f32
    o_ref[...] = (acc + b_ref[...]).astype(o_ref.dtype)


def linear_permute_select(x, weight, bias, index, *, min_pallas_bs=128):
    """Equivalent of the PyTorch forward (modulo index clamping, see TODO)."""
    B, S, K = x.shape
    O = weight.shape[0]
    index = np.asarray(index)
    n_idx = index.shape[0]
    BS = B * S

    # TODO(synk): PyTorch's index_select raises for out-of-range indices
    # (here dim=1 has size O=1 while index contains 1); we clamp to bounds
    # (JAX gather semantics) so the op is well-defined.
    idx_c = np.clip(index, 0, O - 1)
    uniq, inv = np.unique(idx_c, return_inverse=True)   # dedupe: less MXU + HBM writeback
    n_u = int(uniq.shape[0])

    w_sel = jnp.take(weight, jnp.asarray(uniq, jnp.int32), axis=0).astype(x.dtype)      # (n_u, K)
    b_sel = jnp.take(bias, jnp.asarray(uniq, jnp.int32), axis=0).astype(jnp.float32)
    b_sel = b_sel.reshape(n_u, 1)                                                       # (n_u, 1)

    x2 = x.reshape(BS, K)

    if BS < min_pallas_bs or K < 8:
        # Tiny problem: every Pallas tile would be >97% padding; let XLA fuse it.
        acc = jnp.einsum("uk,mk->um", w_sel.astype(jnp.float32), x2.astype(jnp.float32))
        out2d = (acc + b_sel).astype(x.dtype)                                            # (n_u, BS)
    else:
        # One-time wrapper transpose so the kernel does a canonical (n_u,K)x(K,N) dot.
        xt = x2.T                                                                        # (K, BS)

        itemsize = jnp.dtype(x.dtype).itemsize
        # TILE_BS: multiple of 128, <= 1024, double-buffered x tile kept under ~8 MiB
        # so it fits the smallest scoped-VMEM default (v5e: 16 MiB) with headroom.
        tile = min(1024, _round_up(BS, 128))
        max_tile_by_vmem = max(128, (((8 << 20) // (2 * K * itemsize)) // 128) * 128)
        tile = min(tile, max_tile_by_vmem)

        BS_pad = _round_up(BS, tile)
        if BS_pad != BS:
            xt = jnp.pad(xt, ((0, 0), (0, BS_pad - BS)))

        grid = (BS_pad // tile,)

        out2d = pl.pallas_call(
            _linear_rows_kernel,
            out_shape=jax.ShapeDtypeStruct((n_u, BS_pad), x.dtype),
            grid=grid,
            in_specs=[
                pl.BlockSpec((n_u, K), lambda i: (0, 0)),    # weight rows (resident)
                pl.BlockSpec((n_u, 1), lambda i: (0, 0)),    # bias (resident, f32)
                pl.BlockSpec((K, tile), lambda i: (0, i)),   # x, streamed over BS
            ],
            out_specs=pl.BlockSpec((n_u, tile), lambda i: (0, i)),  # lane-dense on BS
            compiler_params=pltpu.CompilerParams(
                dimension_semantics=("parallel",)),          # shards across v7x's 2 TCs
        )(w_sel, b_sel, xt)                                   # (n_u, BS_pad)

        out2d = out2d[:, :BS]

    # Re-expand duplicate index rows and restore the PyTorch output layout.
    out2d = jnp.take(out2d, jnp.asarray(inv, jnp.int32), axis=0)      # (n_idx, BS)
    return jnp.transpose(out2d.reshape(n_idx, B, S), (1, 0, 2))       # (B, n_idx, S)


def _reference(x, weight, bias, index):
    v1 = x @ weight.T + bias                         # (B, S, O)
    v2 = jnp.transpose(v1, (0, 2, 1))                # (B, O, S)
    idx = jnp.clip(jnp.asarray(index), 0, weight.shape[0] - 1)
    return jnp.take(v2, idx, axis=1)                 # (B, n_idx, S)


if __name__ == "__main__":
    key = jax.random.PRNGKey(0)
    index = np.array([1, 0, 1], dtype=np.int32)

    # --- 1) Exact module shapes (tiny -> XLA fallback path, matches semantics) ---
    B, S, K, O = 2, 2, 2, 1
    k1, k2, k3, key = jax.random.split(key, 4)
    x = jax.random.normal(k1, (B, S, K), dtype=jnp.float32)
    bound = 1.0 / (K ** 0.5)
    weight = jax.random.uniform(k2, (O, K), jnp.float32, -bound, bound)
    bias = jax.random.uniform(k3, (O,), jnp.float32, -bound, bound)

    out_small = jax.block_until_ready(linear_permute_select(x, weight, bias, index))
    ref_small = _reference(x, weight, bias, index)
    assert out_small.shape == (B, len(index), S), out_small.shape
    assert jnp.allclose(out_small, ref_small, atol=1e-5, rtol=1e-5)

    # --- 2) Larger shapes to exercise the Pallas kernel path ---
    B2, S2, K2, O2 = 2, 256, 128, 4
    k1, k2, k3, key = jax.random.split(key, 4)
    x2 = jax.random.normal(k1, (B2, S2, K2), dtype=jnp.float32)
    bound2 = 1.0 / (K2 ** 0.5)
    weight2 = jax.random.uniform(k2, (O2, K2), jnp.float32, -bound2, bound2)
    bias2 = jax.random.uniform(k3, (O2,), jnp.float32, -bound2, bound2)

    out_big = jax.block_until_ready(linear_permute_select(x2, weight2, bias2, index))
    ref_big = _reference(x2, weight2, bias2, index)
    assert out_big.shape == (B2, len(index), S2), out_big.shape
    assert jnp.allclose(out_big, ref_big, atol=1e-4, rtol=1e-5)

    print("KERNEL_OK")
</pallas_src>

<mosaic_0001>
module attributes {stable_mosaic.version = 11 : i64} {
  func.func @_linear_rows_kernel(%arg0: i32, %arg1: memref<2x128xf32, #tpu.memory_space<vmem>>, %arg2: memref<2x1xf32, #tpu.memory_space<vmem>>, %arg3: memref<128x512xf32, #tpu.memory_space<vmem>>, %arg4: memref<2x512xf32, #tpu.memory_space<vmem>>) attributes {dimension_semantics = [#tpu.dimension_semantics<parallel>], iteration_bounds = array<i64: 1>, scalar_prefetch = 0 : i64, scratch_operands = 0 : i64, tpu.core_type = #tpu.core_type<tc>, window_params = [{pipeline_mode = #tpu.pipeline_mode<synchronous>, transform_indices = @transform_0, window_bounds = array<i64: 2, 128>}, {pipeline_mode = #tpu.pipeline_mode<synchronous>, transform_indices = @transform_1, window_bounds = array<i64: 2, 1>}, {transform_indices = @transform_2, window_bounds = array<i64: 128, 512>}, {transform_indices = @transform_3, window_bounds = array<i64: 2, 512>}]} {
    %c0 = arith.constant 0 : index
    %c0_0 = arith.constant 0 : index
    %0 = vector.load %arg1[%c0, %c0_0] : memref<2x128xf32, #tpu.memory_space<vmem>>, vector<2x128xf32>
    %c0_1 = arith.constant 0 : index
    %c0_2 = arith.constant 0 : index
    %1 = vector.load %arg3[%c0_1, %c0_2] : memref<128x512xf32, #tpu.memory_space<vmem>>, vector<128x512xf32>
    %cst = arith.constant dense<0.000000e+00> : vector<2x512xf32>
    %2 = tpu.matmul %0, %1, %cst {dimension_numbers = #tpu.dot_dimension_numbers<[1], [0], [0], [1], [0, 0, 1, 1], [], []>} : vector<2x128xf32>, vector<128x512xf32>, vector<2x512xf32> -> vector<2x512xf32>
    %c0_3 = arith.constant 0 : index
    %c0_4 = arith.constant 0 : index
    %3 = vector.load %arg2[%c0_3, %c0_4] : memref<2x1xf32, #tpu.memory_space<vmem>>, vector<2x1xf32>
    %4 = vector.broadcast %3 : vector<2x1xf32> to vector<2x512xf32>
    %5 = arith.addf %2, %4 : vector<2x512xf32>
    %c0_5 = arith.constant 0 : index
    %c0_6 = arith.constant 0 : index
    %6 = vector.load %arg4[%c0_5, %c0_6] : memref<2x512xf32, #tpu.memory_space<vmem>>, vector<2x512xf32>
    tpu.vector_store %arg4[%c0_5, %c0_6], %5 {strides = array<i32>} : memref<2x512xf32, #tpu.memory_space<vmem>>, vector<2x512xf32>,
    return
  }
  func.func @transform_0(%arg0: i32) -> (i32, i32) {
    %c0_i32 = arith.constant 0 : i32
    %c0_i32_0 = arith.constant 0 : i32
    %c0_i32_1 = arith.constant 0 : i32
    return %c0_i32, %c0_i32_0 : i32, i32
  }
  func.func @transform_1(%arg0: i32) -> (i32, i32) {
    %c0_i32 = arith.constant 0 : i32
    %c0_i32_0 = arith.constant 0 : i32
    %c0_i32_1 = arith.constant 0 : i32
    return %c0_i32, %c0_i32_0 : i32, i32
  }
  func.func @transform_2(%arg0: i32) -> (i32, i32) {
    %c0_i32 = arith.constant 0 : i32
    %c0_i32_0 = arith.constant 0 : i32
    return %c0_i32, %arg0 : i32, i32
  }
  func.func @transform_3(%arg0: i32) -> (i32, i32) {
    %c0_i32 = arith.constant 0 : i32
    %c0_i32_0 = arith.constant 0 : i32
    return %c0_i32, %arg0 : i32, i32
  }
}

</mosaic_0001>

<bundles_post_ra>
// kernel: tpu_custom_call.1
= control target key start
LH: loop header
LB: loop body
LE: loop exit
PB: predicated region body
PF: predicated region fallthrough
CT: control target
= control target key end

     0   :  { %8 = vsyncpa [#allocation3], 0  ;;  %s371_s0 = inlined_call_operand.vmem [shape: f32[2,128], index: 0, kind: input, shape index: {}]   ;;  %s372_s1 = inlined_call_operand.vmem [shape: f32[2,1], index: 1, kind: input, shape index: {}]   ;;  %s373_s2 = inlined_call_operand.hbm [shape: f32[128,512], index: 2, kind: input, shape index: {}]   ;;  %s374_s3 = inlined_call_operand.hbm [shape: f32[2,512], index: 3, kind: output, shape index: {}]  }
   0x1   :  { %9 = vsyncpa [#allocation4], 0  ;;  %s332_s12 = smov [#allocation2]  }
   0x2   :  { %s19_s13 = sshll.u32 %s332_s12, 4  ;;  %s20_s13 = int_to_ptr.vmem [resolvable:$true] %s19_s13 }
   0x3   :  { %s296_s14 = scalar_lea.vmem %s20_s13, 8192  ;;  %p301_p1 = scmp.lt.s32.totalorder %s20_s13, %s20_s13 }
   0x4   :  { %p297_p0 = scmp.ne.s32.totalorder %s20_s13, %s296_s14  ;;  %p302_p2 = scmp.lt.s32.totalorder %s296_s14, %s296_s14 }
   0x6   :  { %p303_p3 = por %p302_p2, %p301_p1 }
   0x8   :  { %p304_p4 = pnand %p303_p3, %p297_p0 }
   0xa   :  { %307 = shalt.err (!%p304_p4)
}
   0xb   :  { %s333_s15 = smov 512   ;;  %s334_s16 = smov 32  }
   0xc   :  { %25 = dma.hbm_to_vmem [thread:$0]  %s373_s2, 8192, %s20_s13, [#allocation3], %s333_s15, %s333_s15, %s334_s16  }
   0xd   :  { %328 = dma.done.wait [#allocation3], 8192  }
   0xe   :  { %329 = vsyncadd [#allocation3], 4294959104  ;;  %v335_v0 = vmov 0.0   ;;  %v336_v1 = vmov 0   ;;  %v91_v2 = vld [vmem:[#allocation2 + $0x1e8] sm:$0xff]  ;;  %v93_v3 = vld [vmem:[#allocation2 + $0x1f8] sm:$0xff] }
   0xf   :  { %164 = vmatprep.mubr.f32.mxu0 %v335_v0  ;;  %235 = vmatprep.mubr.f32.mxu1 %v335_v0  ;;  %v90_v4 = vld [vmem:[#allocation2 + $0x1e0] sm:$0xff]  ;;  %v92_v5 = vld [vmem:[#allocation2 + $0x1f0] sm:$0xff]  ;;  %v87_v6 = vld [vmem:[#allocation2 + $0x1c8] sm:$0xff] }
  0x10   :  { %287 = vset.pattern.permute.xlu0 %v336_v1  ;;  %100 = vmatprep.subr.mxu0 %v91_v2  ;;  %v89_v7 = vld [vmem:[#allocation2 + $0x1d8] sm:$0xff]  ;;  %v86_v8 = vld [vmem:[#allocation2 + $0x1c0] sm:$0xff]  ;;  %v88_v9 = vld [vmem:[#allocation2 + $0x1d0] sm:$0xff] }
  0x11   :  { %171 = vmatprep.subr.mxu1 %v93_v3  ;;  %101 = vmatpush1.msra.mxu0 %v90_v4  ;;  %v83_v10 = vld [vmem:[#allocation2 + $0x1a8] sm:$0xff]  ;;  %v85_v11 = vld [vmem:[#allocation2 + $0x1b8] sm:$0xff]  ;;  %v82_v12 = vld [vmem:[#allocation2 + $0x1a0] sm:$0xff]  ;;  %v337_v4 = vmov 1983009808  }
  0x12   :  { %172 = vmatpush1.msra.mxu1 %v92_v5  ;;  %102 = vmatprep.subr.mxu0 %v87_v6  ;;  %v84_v13 = vld [vmem:[#allocation2 + $0x1b0] sm:$0xff]  ;;  %v79_v14 = vld [vmem:[#allocation2 + $0x188] sm:$0xff]  ;;  %v81_v15 = vld [vmem:[#allocation2 + $0x198] sm:$0xff]  ;;  %v249_v5 = vunpack.c.l.s4 %v337_v4  ;;  %v251_v6 = vlaneseq }
  0x13   :  { %173 = vmatprep.subr.mxu1 %v89_v7  ;;  %103 = vmatpush1.msra.mxu0 %v86_v8  ;;  %v78_v16 = vld [vmem:[#allocation2 + $0x180] sm:$0xff]  ;;  %v80_v17 = vld [vmem:[#allocation2 + $0x190] sm:$0xff]  ;;  %v75_v18 = vld [vmem:[#allocation2 + $0x168] sm:$0xff] }
  0x14   :  { %174 = vmatpush1.msra.mxu1 %v88_v9  ;;  %104 = vmatprep.subr.mxu0 %v83_v10  ;;  %v77_v19 = vld [vmem:[#allocation2 + $0x178] sm:$0xff]  ;;  %v74_v20 = vld [vmem:[#allocation2 + $0x160] sm:$0xff]  ;;  %v76_v21 = vld [vmem:[#allocation2 + $0x170] sm:$0xff]  ;;  %v250_v7 = vunpack.c.0.s8 %v249_v5  ;;  %v252_v8 = vshrl.u32 %v251_v6, 7 }
  0x15   :  { %175 = vmatprep.subr.mxu1 %v85_v11  ;;  %105 = vmatpush1.msra.mxu0 %v82_v12  ;;  %v71_v22 = vld [vmem:[#allocation2 + $0x148] sm:$0xff]  ;;  %v73_v23 = vld [vmem:[#allocation2 + $0x158] sm:$0xff]  ;;  %v70_v24 = vld [vmem:[#allocation2 + $0x140] sm:$0xff] }
  0x16   :  { %176 = vmatpush1.msra.mxu1 %v84_v13  ;;  %106 = vmatprep.subr.mxu0 %v79_v14  ;;  %v72_v25 = vld [vmem:[#allocation2 + $0x150] sm:$0xff]  ;;  %v67_v26 = vld [vmem:[#allocation2 + $0x128] sm:$0xff]  ;;  %v69_v27 = vld [vmem:[#allocation2 + $0x138] sm:$0xff]  ;;  %v253_v13 = vsub.s32 %v250_v7, %v252_v8 }
  0x17   :  { %177 = vmatprep.subr.mxu1 %v81_v15  ;;  %107 = vmatpush1.msra.mxu0 %v78_v16  ;;  %v66_v28 = vld [vmem:[#allocation2 + $0x120] sm:$0xff]  ;;  %v68_v29 = vld [vmem:[#allocation2 + $0x130] sm:$0xff]  ;;  %v63_v30 = vld [vmem:[#allocation2 + $0x108] sm:$0xff] }
  0x18   :  { %178 = vmatpush1.msra.mxu1 %v80_v17  ;;  %108 = vmatprep.subr.mxu0 %v75_v18  ;;  %v65_v31 = vld [vmem:[#allocation2 + $0x118] sm:$0xff]  ;;  %v62_v32 = vld [vmem:[#allocation2 + $0x100] sm:$0xff]  ;;  %v64_v33 = vld [vmem:[#allocation2 + $0x110] sm:$0xff] }
  0x19   :  { %179 = vmatprep.subr.mxu1 %v77_v19  ;;  %109 = vmatpush1.msra.mxu0 %v74_v20  ;;  %v59_v34 = vld [vmem:[#allocation2 + $0xe8] sm:$0xff]  ;;  %v61_v35 = vld [vmem:[#allocation2 + $0xf8] sm:$0xff]  ;;  %v58_v36 = vld [vmem:[#allocation2 + $0xe0] sm:$0xff] }
  0x1a   :  { %180 = vmatpush1.msra.mxu1 %v76_v21  ;;  %110 = vmatprep.subr.mxu0 %v71_v22  ;;  %v60_v37 = vld [vmem:[#allocation2 + $0xf0] sm:$0xff]  ;;  %v55_v38 = vld [vmem:[#allocation2 + $0xc8] sm:$0xff]  ;;  %v57_v39 = vld [vmem:[#allocation2 + $0xd8] sm:$0xff] }
  0x1b   :  { %181 = vmatprep.subr.mxu1 %v73_v23  ;;  %111 = vmatpush1.msra.mxu0 %v70_v24  ;;  %v54_v40 = vld [vmem:[#allocation2 + $0xc0] sm:$0xff]  ;;  %v56_v41 = vld [vmem:[#allocation2 + $0xd0] sm:$0xff]  ;;  %v51_v42 = vld [vmem:[#allocation2 + $0xa8] sm:$0xff] }
  0x1c   :  { %182 = vmatpush1.msra.mxu1 %v72_v25  ;;  %112 = vmatprep.subr.mxu0 %v67_v26  ;;  %v53_v43 = vld [vmem:[#allocation2 + $0xb8] sm:$0xff]  ;;  %v50_v44 = vld [vmem:[#allocation2 + $0xa0] sm:$0xff]  ;;  %v52_v45 = vld [vmem:[#allocation2 + $0xb0] sm:$0xff] }
  0x1d   :  { %183 = vmatprep.subr.mxu1 %v69_v27  ;;  %113 = vmatpush1.msra.mxu0 %v66_v28  ;;  %v47_v46 = vld [vmem:[#allocation2 + $0x88] sm:$0xff]  ;;  %v49_v47 = vld [vmem:[#allocation2 + $0x98] sm:$0xff]  ;;  %v46_v48 = vld [vmem:[#allocation2 + $0x80] sm:$0xff] }
  0x1e   :  { %184 = vmatpush1.msra.mxu1 %v68_v29  ;;  %114 = vmatprep.subr.mxu0 %v63_v30  ;;  %v48_v49 = vld [vmem:[#allocation2 + $0x90] sm:$0xff]  ;;  %v43_v50 = vld [vmem:[#allocation2 + $0x68] sm:$0xff]  ;;  %v45_v51 = vld [vmem:[#allocation2 + $0x78] sm:$0xff] }
  0x1f   :  { %185 = vmatprep.subr.mxu1 %v65_v31  ;;  %115 = vmatpush1.msra.mxu0 %v62_v32  ;;  %v42_v52 = vld [vmem:[#allocation2 + $0x60] sm:$0xff]  ;;  %v44_v53 = vld [vmem:[#allocation2 + $0x70] sm:$0xff]  ;;  %v39_v54 = vld [vmem:[#allocation2 + $0x48] sm:$0xff] }
  0x20   :  { %186 = vmatpush1.msra.mxu1 %v64_v33  ;;  %116 = vmatprep.subr.mxu0 %v59_v34  ;;  %v41_v55 = vld [vmem:[#allocation2 + $0x58] sm:$0xff]  ;;  %v38_v56 = vld [vmem:[#allocation2 + $0x40] sm:$0xff]  ;;  %v40_v57 = vld [vmem:[#allocation2 + $0x50] sm:$0xff] }
  0x21   :  { %187 = vmatprep.subr.mxu1 %v61_v35  ;;  %117 = vmatpush1.msra.mxu0 %v58_v36  ;;  %v35_v58 = vld [vmem:[#allocation2 + $0x28] sm:$0xff]  ;;  %v37_v59 = vld [vmem:[#allocation2 + $0x38] sm:$0xff]  ;;  %v34_v60 = vld [vmem:[#allocation2 + $0x20] sm:$0xff] }
  0x22   :  { %188 = vmatpush1.msra.mxu1 %v60_v37  ;;  %118 = vmatprep.subr.mxu0 %v55_v38  ;;  %v36_v61 = vld [vmem:[#allocation2 + $0x30] sm:$0xff]  ;;  %v31_v62 = vld [vmem:[#allocation2 + $0x8] sm:$0xff]  ;;  %v33_v63 = vld [vmem:[#allocation2 + $0x18] sm:$0xff] }
  0x23   :  { %189 = vmatprep.subr.mxu1 %v57_v39  ;;  %119 = vmatpush1.msra.mxu0 %v54_v40  ;;  %v30_v0 = vld [vmem:[#allocation2] sm:$0xff]  ;;  %v32_v1 = vld [vmem:[#allocation2 + $0x10] sm:$0xff] }
  0x24   :  { %190 = vmatpush1.msra.mxu1 %v56_v41  ;;  %120 = vmatprep.subr.mxu0 %v51_v42  ;;  %v29_v2 = vld [vmem:[%s371_s0] sm:$0x3]  ;;  %s338_s0 = smov [#allocation5]  }
  0x25   :  { %191 = vmatprep.subr.mxu1 %v53_v43  ;;  %121 = vmatpush1.msra.mxu0 %v50_v44  ;;  %v94_v3 = vld [vmem:[%s372_s1] sm:$0x3]  ;;  %s271_s1 = sshll.u32 %s338_s0, 4  ;;  %s272_s1 = int_to_ptr.vmem [resolvable:$true] %s271_s1 }
  0x26   :  { %192 = vmatpush1.msra.mxu1 %v52_v45  ;;  %122 = vmatprep.subr.mxu0 %v47_v46  ;;  %s308_s22 = scalar_lea.vmem %s272_s1, 128  ;;  %p313_p6 = scmp.lt.s32.totalorder %s272_s1, %s272_s1 }
  0x27   :  { %193 = vmatprep.subr.mxu1 %v49_v47  ;;  %123 = vmatpush1.msra.mxu0 %v46_v48  ;;  %p309_p5 = scmp.ne.s32.totalorder %s272_s1, %s308_s22  ;;  %p314_p7 = scmp.lt.s32.totalorder %s308_s22, %s308_s22 }
  0x28   :  { %194 = vmatpush1.msra.mxu1 %v48_v49  ;;  %124 = vmatprep.subr.mxu0 %v43_v50 }
  0x29   :  { %195 = vmatprep.subr.mxu1 %v45_v51  ;;  %125 = vmatpush1.msra.mxu0 %v42_v52  ;;  %p315_p8 = por %p314_p7, %p313_p6 }
  0x2a   :  { %196 = vmatpush1.msra.mxu1 %v44_v53  ;;  %126 = vmatprep.subr.mxu0 %v39_v54 }
  0x2b   :  { %197 = vmatprep.subr.mxu1 %v41_v55  ;;  %127 = vmatpush1.msra.mxu0 %v38_v56  ;;  %p316_p9 = pnand %p315_p8, %p309_p5 }
  0x2c   :  { %198 = vmatpush1.msra.mxu1 %v40_v57  ;;  %128 = vmatprep.subr.mxu0 %v35_v58 }
  0x2d   :  { %199 = vmatprep.subr.mxu1 %v37_v59  ;;  %129 = vmatpush1.msra.mxu0 %v34_v60 }
  0x2e   :  { %200 = vmatpush1.msra.mxu1 %v36_v61  ;;  %130 = vmatprep.subr.mxu0 %v31_v62 }
  0x2f   :  { %201 = vmatprep.subr.mxu1 %v33_v63  ;;  %131 = vmatpush1.msra.mxu0 %v30_v0 }
  0x30   :  { %202 = vmatpush1.msra.mxu1 %v32_v1  ;;  %165 = vmatmul.mubr.f32.vlgmr.msra.gmra.mxu0 %v29_v2 }
  0x31   :  { %236 = vmatmul.mubr.f32.vlgmr.msra.gmra.mxu1 %v29_v2  ;;  %97 = vperm.xlu0 %287, %v94_v3  }
  0xac   :  { %v98_v9 = vpop.permute.xlu0 %97 }
  0xf0   :  { %v166_v10 = vpop.f32.mrf.mxu0 }
  0xf1   :  { %v237_v11 = vpop.f32.mrf.mxu1  ;;  %v167_v15 = vadd.f32 %v166_v10, %v98_v9 }
  0xf2   :  { %v168_v12 = vpop.f32.mrf.mxu0  ;;  %v238_v16 = vadd.f32 %v237_v11, %v98_v9 }
  0xf3   :  { %v239_v14 = vpop.f32.mrf.mxu1  ;;  %v169_v17 = vadd.f32 %v168_v12, %v98_v9 }
  0xf4   :  { %v240_v18 = vadd.f32 %v239_v14, %v98_v9 }
  0xf5   :  { %v246_v19 = vcombine.low %v167_v15, %v169_v17 }
  0xf6   :  { %v247_v20 = vcombine.low %v238_v16, %v240_v18 }
  0xf7   :  { %v254_v21 = vrot.slane %v246_v19, %v253_v13 }
  0xf8   :  { %v261_v22 = vrot.slane %v247_v20, %v253_v13 }
  0xfa   :  { %v262_v23 = vcombine.low %v254_v21, %v261_v22 }
  0xfc   :  { %264 = vst [vmem:[#allocation5] sm:$0xff] %v262_v23 }
  0xfd   :  { %319 = shalt.err (!%p316_p9)
}
  0xfe   :  { %274 = dma.vmem_to_hbm [thread:$0]  %s272_s1, 128, %s374_s3, [#allocation4]  }
  0xff   :  { %330 = dma.done.wait [#allocation4], 128  }
 0x100   :  { %331 = vsyncadd [#allocation4], 4294967168 }
 0x101   :  { %278 = vsyncpa [#allocation3], 1 }
 0x102   :  { %279 = vsyncpa [#allocation4], 1 }

</bundles_post_ra>
